<compile_context>
chip_gen: v5e
topology: v5e:2x2
jax: 0.10.0
libtpu: 0.0.40
codegen_flags: <defaults>
</compile_context>

<pallas_src>
import functools

import jax
import jax.numpy as jnp
from jax.experimental import pallas as pl
from jax.experimental.pallas import tpu as pltpu


def _fitnet_kernel(x_ref, w_ref, b_ref, t_ref, out_ref, acc_ref, *,
                   hw, lane_tile, needs_mask, tiles_per_chunk, cast_bf16):
    """One (batch n, spatial chunk c, spatial tile j) step of connector + MSE.

    x_ref  : (Cs, TL)       student channels x spatial lanes (native dtype)
    w_ref  : (Ct, Cs)       1x1-conv weight (feature dtype -> native MXU path)
    b_ref  : (Ct, 1)        1x1-conv bias (f32)
    t_ref  : (Ct, TL)       teacher channels x spatial lanes (native dtype)
    out_ref: (1, 1, 8, 128) per-(n, chunk) partial sum (scalar broadcast)
    acc_ref: (Ct, 1)        f32 VMEM accumulator of lane-reduced squared errors
    """
    c = pl.program_id(1)
    j = pl.program_id(2)

    @pl.when(j == 0)
    def _():
        acc_ref[...] = jnp.zeros_like(acc_ref)

    x = x_ref[...]
    if cast_bf16:
        # Optional precision tradeoff for f32 features: single-pass bf16 MXU.
        x = x.astype(jnp.bfloat16)

    # 1x1 conv == contraction over the student channel dim, in the features'
    # native (low) precision with f32 accumulation on the MXU.
    s = jnp.dot(w_ref[...], x, preferred_element_type=jnp.float32)   # (Ct, TL)
    d = (s + b_ref[...]) - t_ref[...].astype(jnp.float32)

    if needs_mask:
        ragged_idx = hw // lane_tile        # global index of the partial tile
        g = c * tiles_per_chunk + j         # global spatial-tile index

        @pl.when(g != ragged_idx)
        def _():                            # full tiles: zero mask overhead
            acc_ref[...] += jnp.sum(d * d, axis=1, keepdims=True)

        @pl.when(g == ragged_idx)
        def _():                            # ragged tail: select away OOB lanes
            rem = hw - ragged_idx * lane_tile          # static remainder
            lane = jax.lax.broadcasted_iota(jnp.int32, d.shape, 1)
            dm = jnp.where(lane < rem, d, 0.0)         # before squaring
            acc_ref[...] += jnp.sum(dm * dm, axis=1, keepdims=True)
    else:
        acc_ref[...] += jnp.sum(d * d, axis=1, keepdims=True)

    @pl.when(j == pl.num_programs(2) - 1)
    def _():
        out_ref[...] = jnp.full(out_ref.shape, jnp.sum(acc_ref[...]),
                                jnp.float32)


def _pick_lane_tile(hw, bytes_per_lane, budget_bytes):
    """Largest spatial (lane) tile the VMEM budget allows, floor 512, preferring
    a size that divides hw exactly so the ragged-tail mask is never needed."""
    max_tl = (budget_bytes // max(bytes_per_lane, 1)) // 128 * 128
    max_tl = max(max_tl, 512)          # 512-lane floor: DMA efficiency dominates
    if hw <= max_tl:
        return hw                      # single full-extent tile, never masked
    # Prefer an exact divisor (multiple of 128) unless it would shrink the
    # tile below ~half of the budget-limited size.
    for cand in range(max_tl, max(max_tl // 2, 128) - 1, -128):
        if hw % cand == 0:
            return cand
    return max_tl                      # ragged tail -> masked on last tile only


def fitnet_loss(y_s, y_t, weight, bias, alpha, *,
                mxu_bf16_for_f32=False, lane_tile_override=None):
    """alpha * MSE(conv1x1(y_s; weight, bias), y_t).

    y_s:    (N, Cs, H, W)  student feature (NCHW, matching PyTorch)
    y_t:    (N, Ct, H, W)  teacher feature (NCHW)
    weight: (Ct, Cs)       1x1 conv weight (PyTorch conv weight squeezed)
    bias:   (Ct,)          1x1 conv bias
    """
    n, cs, h, w = y_s.shape
    nt, ct, ht, wt = y_t.shape
    assert (n, h, w) == (nt, ht, wt), "student/teacher spatial shapes must match"
    hw = h * w

    # Free reshapes only: stay NCHW, native dtype -> no extra HBM copies.
    xs = y_s.reshape(n, cs, hw)
    xt = y_t.reshape(n, ct, hw)

    # Keep the MXU on the native low-precision path: weight takes the feature
    # dtype (bf16 x bf16 -> f32 when features are bf16).  No f32 upcast of x.
    cast_bf16 = bool(mxu_bf16_for_f32) and xs.dtype == jnp.float32
    w_dtype = jnp.bfloat16 if cast_bf16 else xs.dtype
    wmat = weight.astype(w_dtype)                     # (Ct, Cs), tiny, resident
    bvec = bias.astype(jnp.float32).reshape(ct, 1)    # (Ct, 1)

    itm_s = jnp.dtype(xs.dtype).itemsize
    itm_t = jnp.dtype(xt.dtype).itemsize

    # Generation-aware VMEM budget (v5e/v6e: 128 MiB -> ~21 MiB; v7x: 64 MiB
    # -> ~10 MiB of streaming buffers).
    try:
        vmem_cap = int(pltpu.get_tpu_info().vmem_capacity_bytes)
    except Exception:
        vmem_cap = 64 * 1024 * 1024
    budget = min(vmem_cap // 6, 24 * 1024 * 1024)

    # Per-lane VMEM bytes: double-buffered x & t tiles + f32 matmul/elementwise
    # temporaries (s, d, d*d, t upcast ~ 4*Ct*4 B) + optional bf16 x copy.
    bytes_per_lane = (2 * (cs * itm_s + ct * itm_t) + 16 * ct
                      + (2 * cs if cast_bf16 else 0))

    if lane_tile_override is not None:
        lane_tile = int(lane_tile_override)           # test hook only
    else:
        lane_tile = _pick_lane_tile(hw, bytes_per_lane, budget)
    needs_mask = (hw % lane_tile) != 0
    num_tiles = pl.cdiv(hw, lane_tile)

    # Parallel spatial chunks: give both v7x TensorCores work when batch
    # parallelism alone is insufficient (no-op on single-TC v5e/v6e).
    n_chunks = 2 if (n % 2 == 1 and num_tiles % 2 == 0 and num_tiles >= 2) else 1
    tiles_per_chunk = num_tiles // n_chunks

    kernel = functools.partial(
        _fitnet_kernel, hw=hw, lane_tile=lane_tile, needs_mask=needs_mask,
        tiles_per_chunk=tiles_per_chunk, cast_bf16=cast_bf16)

    # Scoped-VMEM limit with headroom for the streaming buffers + temporaries
    # + resident weight; capped well under the 64-MiB physical VMEM of v7x.
    w_bytes = cs * ct * jnp.dtype(w_dtype).itemsize + ct * 4
    est = lane_tile * bytes_per_lane + 2 * w_bytes + (1 << 20)
    upper = (40 << 20) if vmem_cap <= (64 << 20) else (64 << 20)
    vmem_limit = int(min(max(est + est // 2, 16 << 20), upper))

    cost = pl.CostEstimate(
        flops=2 * n * hw * cs * ct,
        transcendentals=0,
        bytes_accessed=n * hw * (cs * itm_s + ct * itm_t)
        + (cs * ct + ct) * 4 + n * n_chunks * 8 * 128 * 4,
    )

    partial = pl.pallas_call(
        kernel,
        out_shape=jax.ShapeDtypeStruct((n, n_chunks, 8, 128), jnp.float32),
        grid_spec=pltpu.PrefetchScalarGridSpec(
            num_scalar_prefetch=0,
            grid=(n, n_chunks, tiles_per_chunk),
            in_specs=[
                pl.BlockSpec((None, cs, lane_tile),                       # student
                             lambda i, c, j: (i, 0, c * tiles_per_chunk + j)),
                pl.BlockSpec((ct, cs), lambda i, c, j: (0, 0)),           # weight
                # TODO(synk): (Ct, 1) bias block is lane-sparse; fine for
                # realistic FitNet channel counts (low-priority per review).
                pl.BlockSpec((ct, 1), lambda i, c, j: (0, 0)),            # bias
                pl.BlockSpec((None, ct, lane_tile),                       # teacher
                             lambda i, c, j: (i, 0, c * tiles_per_chunk + j)),
            ],
            out_specs=pl.BlockSpec((1, 1, 8, 128), lambda i, c, j: (i, c, 0, 0)),
            scratch_shapes=[pltpu.VMEM((ct, 1), jnp.float32)],
        ),
        compiler_params=pltpu.CompilerParams(
            dimension_semantics=("parallel", "parallel", "arbitrary"),
            vmem_limit_bytes=vmem_limit),
        cost_estimate=cost,
    )(xs, wmat, bvec, xt)

    n_elems = n * ct * hw                  # mean over teacher-shaped output
    scale = float(alpha) / float(n_elems)
    return scale * jnp.sum(partial[:, :, 0, 0])


class FitNetCriterion:
    """JAX/Pallas port of the PyTorch FitNetCriterion."""

    def __init__(self, channels, alpha, connector_cfg=None):
        # channels = (student_channels, teacher_channels)
        cs, ct = channels
        self.alpha = alpha
        # TODO(synk): the PyTorch spec leaves the connector construction to
        # connector_cfg; we synthesize a deterministic 1x1-conv connector.
        kw, kb = jax.random.split(jax.random.PRNGKey(42))
        self.weight = jax.random.normal(kw, (ct, cs), jnp.float32) * 0.1
        self.bias = jax.random.normal(kb, (ct,), jnp.float32) * 0.01

    @staticmethod
    def get_logits(s_hook, t_hook):
        (y_s,) = list(s_hook.values())
        (y_t,) = list(t_hook.values())
        return y_s, y_t

    def compute_loss(self, y_s, y_t):
        return fitnet_loss(y_s, y_t, self.weight, self.bias, self.alpha)

    def forward(self, s_hook, t_hook):
        y_s, y_t = self.get_logits(s_hook, t_hook)
        loss = self.compute_loss(y_s, y_t)
        return (loss, {"teacher_logits": y_t})

    __call__ = forward


def _ref_loss(y_s, y_t, weight, bias, alpha):
    n, cs = y_s.shape[0], y_s.shape[1]
    ct = y_t.shape[1]
    xs = jnp.transpose(y_s.astype(jnp.float32), (0, 2, 3, 1)).reshape(-1, cs)
    xt = jnp.transpose(y_t.astype(jnp.float32), (0, 2, 3, 1)).reshape(-1, ct)
    wf = weight.astype(jnp.float32)
    return alpha * jnp.mean((xs @ wf.T + bias.astype(jnp.float32) - xt) ** 2)


if __name__ == "__main__":
    # ---- 1) Main check: f32 NCHW features, small shapes ---------------------
    N, CS, CT, H, W = 2, 4, 8, 16, 16
    key = jax.random.PRNGKey(0)
    ks, kt = jax.random.split(key)
    y_s = jax.random.normal(ks, (N, CS, H, W), jnp.float32)   # student NCHW
    y_t = jax.random.normal(kt, (N, CT, H, W), jnp.float32)   # teacher NCHW

    crit = FitNetCriterion(channels=(CS, CT), alpha=1.0)
    loss, aux = crit({"feat": y_s}, {"feat": y_t})
    loss = jax.block_until_ready(loss)

    ref = _ref_loss(y_s, y_t, crit.weight, crit.bias, crit.alpha)
    assert jnp.allclose(loss, ref, rtol=1e-4, atol=1e-6), (loss, ref)
    assert aux["teacher_logits"].shape == (N, CT, H, W)

    # ---- 2) bf16 features: native low-precision MXU path --------------------
    CSB, CTB = 16, 16
    k1, k2 = jax.random.split(jax.random.PRNGKey(1))
    y_sb = jax.random.normal(k1, (2, CSB, H, W), jnp.float32).astype(jnp.bfloat16)
    y_tb = jax.random.normal(k2, (2, CTB, H, W), jnp.float32).astype(jnp.bfloat16)
    crit_b = FitNetCriterion(channels=(CSB, CTB), alpha=0.5)
    loss_b = jax.block_until_ready(crit_b.compute_loss(y_sb, y_tb))
    # reference uses the bf16-rounded weight so only accumulation order differs
    ref_b = _ref_loss(y_sb, y_tb,
                      crit_b.weight.astype(jnp.bfloat16).astype(jnp.float32),
                      crit_b.bias, crit_b.alpha)
    assert jnp.allclose(loss_b, ref_b, rtol=2e-2, atol=1e-5), (loss_b, ref_b)

    # ---- 3) Ragged spatial tail + chunk-parallel path (forced small tile) ---
    k3, k4 = jax.random.split(jax.random.PRNGKey(2))
    y_s3 = jax.random.normal(k3, (1, CS, 20, 20), jnp.float32)   # hw=400
    y_t3 = jax.random.normal(k4, (1, CT, 20, 20), jnp.float32)
    crit3 = FitNetCriterion(channels=(CS, CT), alpha=2.0)
    loss3 = jax.block_until_ready(
        fitnet_loss(y_s3, y_t3, crit3.weight, crit3.bias, crit3.alpha,
                    lane_tile_override=128))   # 4 tiles, 2 chunks, masked tail
    ref3 = _ref_loss(y_s3, y_t3, crit3.weight, crit3.bias, crit3.alpha)
    assert jnp.allclose(loss3, ref3, rtol=1e-4, atol=1e-6), (loss3, ref3)

    print("KERNEL_OK")
</pallas_src>

<mosaic_0001>
module attributes {stable_mosaic.version = 11 : i64} {
  func.func @_fitnet_kernel(%arg0: i32, %arg1: i32, %arg2: i32, %arg3: memref<1x4x256xf32, #tpu.memory_space<vmem>>, %arg4: memref<8x4xf32, #tpu.memory_space<vmem>>, %arg5: memref<8x1xf32, #tpu.memory_space<vmem>>, %arg6: memref<1x8x256xf32, #tpu.memory_space<vmem>>, %arg7: memref<1x1x8x128xf32, #tpu.memory_space<vmem>>, %arg8: memref<8x1xf32, #tpu.memory_space<vmem>>) attributes {dimension_semantics = [#tpu.dimension_semantics<parallel>, #tpu.dimension_semantics<parallel>, #tpu.dimension_semantics<arbitrary>], iteration_bounds = array<i64: 2, 1, 1>, scalar_prefetch = 0 : i64, scratch_operands = 1 : i64, tpu.core_type = #tpu.core_type<tc>, window_params = [{transform_indices = @transform_0, window_bounds = array<i64: 1, 4, 256>}, {pipeline_mode = #tpu.pipeline_mode<synchronous>, transform_indices = @transform_1, window_bounds = array<i64: 8, 4>}, {pipeline_mode = #tpu.pipeline_mode<synchronous>, transform_indices = @transform_2, window_bounds = array<i64: 8, 1>}, {transform_indices = @transform_3, window_bounds = array<i64: 1, 8, 256>}, {transform_indices = @transform_4, window_bounds = array<i64: 1, 1, 8, 128>}]} {
    %c0_i32 = arith.constant 0 : i32
    %0 = arith.cmpi eq, %arg2, %c0_i32 : i32
    %1 = arith.extui %0 : i1 to i32
    %c0_i32_0 = arith.constant 0 : i32
    %2 = arith.cmpi ne, %1, %c0_i32_0 : i32
    scf.if %2 {
      %cst_17 = arith.constant 0.000000e+00 : f32
      %22 = vector.broadcast %cst_17 : f32 to vector<8x1xf32>
      %c0_18 = arith.constant 0 : index
      %c0_19 = arith.constant 0 : index
      %23 = vector.load %arg8[%c0_18, %c0_19] : memref<8x1xf32, #tpu.memory_space<vmem>>, vector<8x1xf32>
      tpu.vector_store %arg8[%c0_18, %c0_19], %22 {strides = array<i32>} : memref<8x1xf32, #tpu.memory_space<vmem>>, vector<8x1xf32>,
    } else {
    }
    %c0 = arith.constant 0 : index
    %c0_1 = arith.constant 0 : index
    %c0_2 = arith.constant 0 : index
    %3 = vector.load %arg3[%c0, %c0_1, %c0_2] : memref<1x4x256xf32, #tpu.memory_space<vmem>>, vector<1x4x256xf32>
    %4 = vector.shape_cast %3 : vector<1x4x256xf32> to vector<4x256xf32>
    %c0_3 = arith.constant 0 : index
    %c0_4 = arith.constant 0 : index
    %5 = vector.load %arg4[%c0_3, %c0_4] : memref<8x4xf32, #tpu.memory_space<vmem>>, vector<8x4xf32>
    %cst = arith.constant dense<0.000000e+00> : vector<8x256xf32>
    %6 = tpu.matmul %5, %4, %cst {dimension_numbers = #tpu.dot_dimension_numbers<[1], [0], [0], [1], [0, 0, 1, 1], [], []>} : vector<8x4xf32>, vector<4x256xf32>, vector<8x256xf32> -> vector<8x256xf32>
    %c0_5 = arith.constant 0 : index
    %c0_6 = arith.constant 0 : index
    %7 = vector.load %arg5[%c0_5, %c0_6] : memref<8x1xf32, #tpu.memory_space<vmem>>, vector<8x1xf32>
    %8 = vector.broadcast %7 : vector<8x1xf32> to vector<8x256xf32>
    %9 = arith.addf %6, %8 : vector<8x256xf32>
    %c0_7 = arith.constant 0 : index
    %c0_8 = arith.constant 0 : index
    %c0_9 = arith.constant 0 : index
    %10 = vector.load %arg6[%c0_7, %c0_8, %c0_9] : memref<1x8x256xf32, #tpu.memory_space<vmem>>, vector<1x8x256xf32>
    %11 = vector.shape_cast %10 : vector<1x8x256xf32> to vector<8x256xf32>
    %12 = arith.subf %9, %11 : vector<8x256xf32>
    %c0_10 = arith.constant 0 : index
    %c0_11 = arith.constant 0 : index
    %13 = vector.load %arg8[%c0_10, %c0_11] : memref<8x1xf32, #tpu.memory_space<vmem>>, vector<8x1xf32>
    %14 = arith.mulf %12, %12 : vector<8x256xf32>
    %cst_12 = arith.constant dense<0.000000e+00> : vector<8xf32>
    %15 = vector.multi_reduction <add>, %14, %cst_12 [1] : vector<8x256xf32> to vector<8xf32>
    %16 = vector.shape_cast %15 : vector<8xf32> to vector<8x1xf32>
    %17 = arith.addf %13, %16 : vector<8x1xf32>
    %c0_13 = arith.constant 0 : index
    %c0_14 = arith.constant 0 : index
    %18 = vector.load %arg8[%c0_13, %c0_14] : memref<8x1xf32, #tpu.memory_space<vmem>>, vector<8x1xf32>
    tpu.vector_store %arg8[%c0_13, %c0_14], %17 {strides = array<i32>} : memref<8x1xf32, #tpu.memory_space<vmem>>, vector<8x1xf32>,
    %c0_i32_15 = arith.constant 0 : i32
    %19 = arith.cmpi eq, %arg2, %c0_i32_15 : i32
    %20 = arith.extui %19 : i1 to i32
    %c0_i32_16 = arith.constant 0 : i32
    %21 = arith.cmpi ne, %20, %c0_i32_16 : i32
    scf.if %21 {
      %c0_17 = arith.constant 0 : index
      %c0_18 = arith.constant 0 : index
      %22 = vector.load %arg8[%c0_17, %c0_18] : memref<8x1xf32, #tpu.memory_space<vmem>>, vector<8x1xf32>
      %23 = vector.shape_cast %22 : vector<8x1xf32> to vector<1x8x1xf32>
      %cst_19 = arith.constant dense<0.000000e+00> : vector<1xf32>
      %24 = vector.multi_reduction <add>, %23, %cst_19 [1, 2] : vector<1x8x1xf32> to vector<1xf32>
      %25 = vector.shape_cast %24 : vector<1xf32> to vector<1x1x1xf32>
      %26 = vector.extract %25[0, 0, 0] : f32 from vector<1x1x1xf32>
      %27 = vector.broadcast %26 : f32 to vector<1x1x8x128xf32>
      %c0_20 = arith.constant 0 : index
      %c0_21 = arith.constant 0 : index
      %c0_22 = arith.constant 0 : index
      %c0_23 = arith.constant 0 : index
      %28 = vector.load %arg7[%c0_20, %c0_21, %c0_22, %c0_23] : memref<1x1x8x128xf32, #tpu.memory_space<vmem>>, vector<1x1x8x128xf32>
      tpu.vector_store %arg7[%c0_20, %c0_21, %c0_22, %c0_23], %27 {strides = array<i32>} : memref<1x1x8x128xf32, #tpu.memory_space<vmem>>, vector<1x1x8x128xf32>,
    } else {
    }
    return
  }
  func.func @transform_0(%arg0: i32, %arg1: i32, %arg2: i32) -> (i32, i32, i32) {
    %c1_i32 = arith.constant 1 : i32
    %0 = arith.muli %arg1, %c1_i32 : i32
    %1 = arith.addi %0, %arg2 : i32
    %c0_i32 = arith.constant 0 : i32
    %c0_i32_0 = arith.constant 0 : i32
    return %arg0, %c0_i32, %1 : i32, i32, i32
  }
  func.func @transform_1(%arg0: i32, %arg1: i32, %arg2: i32) -> (i32, i32) {
    %c0_i32 = arith.constant 0 : i32
    %c0_i32_0 = arith.constant 0 : i32
    %c0_i32_1 = arith.constant 0 : i32
    return %c0_i32, %c0_i32_0 : i32, i32
  }
  func.func @transform_2(%arg0: i32, %arg1: i32, %arg2: i32) -> (i32, i32) {
    %c0_i32 = arith.constant 0 : i32
    %c0_i32_0 = arith.constant 0 : i32
    %c0_i32_1 = arith.constant 0 : i32
    return %c0_i32, %c0_i32_0 : i32, i32
  }
  func.func @transform_3(%arg0: i32, %arg1: i32, %arg2: i32) -> (i32, i32, i32) {
    %c1_i32 = arith.constant 1 : i32
    %0 = arith.muli %arg1, %c1_i32 : i32
    %1 = arith.addi %0, %arg2 : i32
    %c0_i32 = arith.constant 0 : i32
    %c0_i32_0 = arith.constant 0 : i32
    return %arg0, %c0_i32, %1 : i32, i32, i32
  }
  func.func @transform_4(%arg0: i32, %arg1: i32, %arg2: i32) -> (i32, i32, i32, i32) {
    %c0_i32 = arith.constant 0 : i32
    %c0_i32_0 = arith.constant 0 : i32
    %c0_i32_1 = arith.constant 0 : i32
    return %arg0, %arg1, %c0_i32, %c0_i32_0 : i32, i32, i32, i32
  }
}

</mosaic_0001>

<bundles_post_ra>
// kernel: tpu_custom_call.1
= control target key start
LH: loop header
LB: loop body
LE: loop exit
PB: predicated region body
PF: predicated region fallthrough
CT: control target
= control target key end

     0   :  { %9 = vsyncpa [#allocation4], 0  ;;  %s871_s0 = inlined_call_operand.vmem [shape: f32[2,4,256], index: 0, kind: input, shape index: {}]   ;;  %s872_s1 = inlined_call_operand.vmem [shape: f32[8,4], index: 1, kind: input, shape index: {}]   ;;  %s873_s2 = inlined_call_operand.vmem [shape: f32[8,1], index: 2, kind: input, shape index: {}]   ;;  %s874_s3 = inlined_call_operand.hbm [shape: f32[2,8,256], index: 3, kind: input, shape index: {}]   ;;  %s875_s4 = inlined_call_operand.hbm [shape: f32[2,1,8,128], index: 4, kind: output, shape index: {}]  }
   0x1   :  { %11 = vsyncpa [#allocation4 + $0x1], 0 }
   0x2   :  { %12 = vsyncpa [#allocation5], 0 }
   0x3   :  { %14 = vsyncpa [#allocation5 + $0x1], 0  ;;  %s736_s15 = smov 0   ;;  %s738_s16 = smov 0  }
   0x4   :  { %s740_s17 = smov 0   ;;  %s742_s18 = smov 0  }
   0x5   :  { %s744_s19 = smov 0   ;;  %s746_s20 = smov 0  }
   0x6 LB: > { %s506_s21 = sadd.s32 4294967295, %s707_s20   ;;  %s507_s22 = sadd.s32 4294967294, %s707_s20   ;;  %s707_s20 = sphi %s746_s20, %s20_s20   ;;  %s703_s19 = sphi %s744_s19, %s884_s19   ;;  %s699_s18 = sphi %s742_s18, %s883_s18   ;;  %s695_s17 = sphi %s740_s17, %s882_s17   ;;  %s691_s16 = sphi %s738_s16, %s881_s16   ;;  %s687_s15 = sphi %s736_s15, %s880_s15  }
   0x7   : > { %s39_s23 = sadd.s32 1, %s703_s19  ;;  %s122_s24 = sadd.s32 1, %s695_s17 }
   0x8   : > { %p41_p0 = scmp.ge.s32.totalorder %s39_s23, 2  ;;  %p129_p1 = scmp.ne.s32.totalorder %s695_s17, %s691_s16 }
   0x9   : > { %p130_p2 = scmp.eq.s32.totalorder %s707_s20, 0  ;;  %p135_p3 = scmp.ne.s32.totalorder %s691_s16, %s687_s15 }
   0xa   : > { %s886_s23 = smov (%p41_p0, %s39_s23), 0  ;;  %p136_p5 = scmp.eq.s32.totalorder %s506_s21, 0 }
   0xb   : > { %p777_p4 = por %p130_p2, %p129_p1  ;;  %s117_s26 = ssub.s32 %s703_s19, %s886_s23 }
   0xc   : > { %p161_p6 = scmp.eq.s32.totalorder %s506_s21, 1  ;;  %p120_p7 = scmp.eq.s32.totalorder %s117_s26, 0 }
   0xd   : > { %p783_p8 = por %p136_p5, %p135_p3  ;;  %p167_p10 = scmp.eq.s32.totalorder %s507_s22, 1 }
   0xe   : > { %p787_p9 = por %p161_p6, %p129_p1  ;;  %p509_p12 = scmp.ge.s32.totalorder %s707_s20, 2 }
   0xf   : > { %s792_s29 = scalar_select %p120_p7, %s695_s17, %s122_s24  }
  0x10   : > { %p794_p11 = por %p167_p10, %p135_p3  ;;  %p542_p13 = scmp.lt.s32.totalorder %s707_s20, 2 }
  0x11   : > { %s208_s5 = sand.u32 1, %s695_s17   ;;  %s526_s7 = sshll.u32 %s703_s19, 4 }
  0x12   : > { %s510_s6 = sshll.u32 %s208_s5, 4  ;;  %s220_s10 = scalar_lea.hbm %s874_s3, %s526_s7 }
  0x13   : > { %s212_s11 = scalar_lea.vmem [#allocation3], %s510_s6  ;;  %s222_s13 = sshll.u32 %s220_s10, 4  ;;  %s223_s13 = int_to_ptr.hbm [resolvable:$true] %s222_s13 }
  0x14   : > { %s224_s12 = sshll.u32 %s212_s11, 4  ;;  %p535_p0 = pnand %p542_p13, %p777_p4  ;;  %s225_s12 = int_to_ptr.vmem [resolvable:$true] %s224_s12 }
  0x15   : > { %p513_p1 = scmp.ge.s32.totalorder %s707_s20, 1  ;;  %p229_p2 = scmp.lt.s32.totalorder %s707_s20, 3 }
  0x16   : > { %s209_s14 = scalar_lea.sflag [#allocation4], %s208_s5 }
  0x17   : > { %537 = dma.hbm_to_vmem [thread:$0]  (!%p535_p0), %s223_s13, 256, %s225_s12, %s209_s14  }
  0x18   : > { %p230_p3 = pnand %p513_p1, %p229_p2 }
  0x19   : > { %s810_s21 = sand.u32 (!%p230_p3), 1, %s691_s16  }
  0x1a   : > { %233 = sbr.rel (%p230_p3) target bundleno = 491 (0x1eb), region = 36  ;;  %s514_s22 = sshll.u32 (!%p230_p3), %s810_s21, 4 }
  0x1b   : > { %s236_s24 = scalar_lea.sflag (!%p230_p3), [#allocation4], %s810_s21  ;;  %s239_s26 = scalar_lea.vmem (!%p230_p3), [#allocation3], %s514_s22 }
  0x1f   : > { %678 = dma.done.wait (%p783_p8), %s236_s24, 256  }
  0x20   : > { %680 = vsyncadd (%p783_p8), %s236_s24, 4294967040  ;;  %p277_p4 = scmp.lt.s32.totalorder %s699_s18, 1  ;;  %v709_v0 = vmov 0   ;;  %v297_v2 = vld [vmem:[%s873_s2] sm:$0xff]  ;;  %vm311_vm0 = vcmask 1043456   ;;  %vm307_vm1 = vcmask 31744  }
  0x21   : > { %594 = vset.pattern.permute.xlu0 %v709_v0  ;;  %v296_v3 = vld [vmem:[%s872_s1] sm:$0xff]  ;;  %vm293_vm2 = vcmask 7168   ;;  %v710_v6 = vmov 0.0   ;;  %v357_v11 = vld [vmem:[%s239_s26 + $0x8] sm:$0xff]  ;;  %s515_s12 = sshll.u32 %s810_s21, 3  ;;  %s523_s13 = sshll.u32 %s699_s18, 3 }
  0x22   : > { %s278_s25 = scalar_select %p277_p4, %s699_s18, 1  ;;  %300 = vperm.xlu0 %594, %v297_v2   ;;  %294 = vst.msk [vmem:[#allocation2] sm:$0xff] %vm293_vm2, %v710_v6  ;;  %v356_v9 = vld [vmem:[%s239_s26] sm:$0xff] }
  0x23   : > { %s397_s24 = scalar_lea.hbm %s875_s4, %s523_s13  ;;  %s274_s26 = scalar_lea.vmem [#allocation6], %s515_s12 }
  0x24   : > { %s527_s5 = sshll.u32 %s278_s25, 3  ;;  %s399_s25 = sshll.u32 %s274_s26, 4  ;;  %s400_s25 = int_to_ptr.vmem [resolvable:$true] %s399_s25 }
  0x25   : > { %s284_s8 = scalar_lea.vmem %s871_s0, %s527_s5  ;;  %s401_s5 = sshll.u32 %s397_s24, 4  ;;  %s402_s5 = int_to_ptr.hbm [resolvable:$true] %s401_s5 }
  0x26   : > { %v295_v1 = vld [vmem:[%s284_s8] sm:$0xff]  ;;  %s386_s7 = scalar_lea.sflag [#allocation5], %s810_s21  ;;  %s639_s8 = sshra.s32 %s402_s5, 4  ;;  %s640_s8 = int_to_ptr.hbm [resolvable:$true] %s639_s8 }
  0x27   : > { %304 = vst [vmem:[#allocation1] ss:$2 sm:$0xff] %v295_v1  ;;  %s641_s9 = scalar_lea.hbm %s640_s8, 8  ;;  %s645_s27 = scalar_lea.hbm %s875_s4, 16 }
  0x28   : > { %p642_p5 = scmp.ne.s32.totalorder %s640_s8, %s641_s9  ;;  %p646_p8 = scmp.lt.s32.totalorder %s640_s8, %s875_s4 }
  0x29   : > { %v360_v19 = vld [vmem:[#allocation2] sm:$0xff]  ;;  %p647_p10 = scmp.lt.s32.totalorder %s645_s27, %s641_s9 }
  0x2a   : > { %p643_p6 = pnand %p642_p5, %p787_p9 }
  0x2b   : > { %p648_p13 = por %p647_p10, %p646_p8 }
  0x2c   : > { %p644_p7 = pneg %p643_p6 }
  0x2e   : > { %v305_v4 = vld.sshfl [vmem:[#allocation1] sm:$0xff pattern:$0x75316420]  ;;  %v306_v5 = vld.sshfl [vmem:[#allocation1 + $0x8] sm:$0xff pattern:$0x75316420]  ;;  %p649_p0 = pnand %p648_p13, %p644_p7 }
  0x2f   : > { %518 = vmatpush.msk.msra.mxu0 %vm311_vm0, %v305_v4  ;;  %520 = vmatpush.msk.msra.mxu1 %vm311_vm0, %v306_v5 }
  0x30   : > { %519 = vmatmul.msk.f32.vlgmr.msra.gmra.mxu0 %vm307_vm1, %v296_v3  ;;  %521 = vmatmul.msk.f32.vlgmr.msra.gmra.mxu1 %vm307_vm1, %v296_v3 }
  0x94   : > { %v301_v7 = vpop.permute.xlu0 %300 }
  0xad   : > { %v333_v8 = vpop.f32.mrf.mxu0  ;;  %v353_v10 = vpop.f32.mrf.mxu1 }
  0xae   : > { %v334_v12 = vadd.f32 %v333_v8, %v301_v7  ;;  %v354_v13 = vadd.f32 %v353_v10, %v301_v7 }
  0xb0   : > { %v358_v14 = vsub.f32 %v334_v12, %v356_v9  ;;  %v359_v15 = vsub.f32 %v354_v13, %v357_v11 }
  0xb2   : > { %v361_v16 = vmul.f32 %v358_v14, %v358_v14  ;;  %v362_v17 = vmul.f32 %v359_v15, %v359_v15 }
  0xb4   : > { %v363_v18 = vadd.f32 %v362_v17, %v361_v16 }
  0xb6   : > { %364 = vadd.xlane.f32.xlu0 %v363_v18 }
 0x129   : > { %v365_v20 = vpop.xlane.xlu0 %364 }
 0x12a   : > { %v366_v21 = vadd.f32 %v365_v20, %v360_v19 }
 0x12c   : > { %368 = vst.msk [vmem:[#allocation2] sm:$0xff] %vm293_vm2, %v366_v21 }
 0x133   : > { %v372_v22 = vld [vmem:[#allocation2] sm:$0xff] }
 0x134   : > { %v373_v23 = vsel %vm293_vm2, %v372_v22, 0.0 }
 0x135   : > { %374 = vadd.xlane.f32.xlu1 %v373_v23 }
 0x1a8   : > { %v375_v24 = vpop.xlane.xlu1 %374 }
 0x1a9   : > { %v376_v25 = vrot.slane %v375_v24, 4 }
 0x1ab   : > { %v377_v26 = vadd.f32 %v376_v25, %v375_v24 }
 0x1ad   : > { %v378_v27 = vrot.slane %v377_v26, 2 }
 0x1af   : > { %v379_v28 = vadd.f32 %v378_v27, %v377_v26 }
 0x1b1   : > { %v380_v29 = vrot.slane %v379_v28, 1 }
 0x1b3   : > { %v381_v30 = vadd.f32 %v380_v29, %v379_v28 }
 0x1b5   : > { %528 = vpush %v381_v30 }
 0x1e6   : > { %s529_s6 = spop %528 }
 0x1e7   : > { %v383_v31 = vstv %s529_s6 }
 0x1e8   : > { %384 = vst [vmem:[%s274_s26] sm:$0xff] %v383_v31 }
 0x1e9   : > { %652 = shalt.err (!%p649_p0)
}
 0x1ea   : > { %532 = dma.vmem_to_hbm [thread:$0]  (%p787_p9), %s400_s25, 128, %s402_s5, %s386_s7  }
 0x1eb PF: > { %s413_s21 = sand.u32 1, %s687_s15   ;;  %p539_p1 = pnand %p509_p12, %p794_p11 }
 0x1ec   : > { %s414_s13 = scalar_lea.sflag [#allocation5], %s413_s21 }
 0x1ed   : > { %p540_p2 = pneg %p539_p1 }
 0x1ef   : > { %682 = dma.done.wait (%p540_p2), %s414_s13, 128  }
 0x1f0   : > { %684 = vsyncadd (%p540_p2), %s414_s13, 4294967168  ;;  %s20_s20 = sadd.s32 1, %s707_s20   ;;  %s880_s15 = smov %s691_s16 }
 0x1f1   : > { %p17_p3 = scmp.ge.s32.totalorder %s20_s20, 4   ;;  %s881_s16 = smov %s695_s17 }
 0x1f2   : > { %s882_s17 = smov %s792_s29  ;;  %s883_s18 = smov %s703_s19 }
 0x1f3   : > { %s884_s19 = smov %s886_s23  ;;  %19 = sbr.rel (!%p17_p3) target bundleno = 6 (0x6), region = 92 }
 0x1f8   :  { %420 = vsyncpa [#allocation4], 1 }
 0x1f9   :  { %422 = vsyncpa [#allocation4 + $0x1], 1 }
 0x1fa   :  { %423 = vsyncpa [#allocation5], 1 }
 0x1fb   :  { %425 = vsyncpa [#allocation5 + $0x1], 1 }

</bundles_post_ra>
